<compile_context>
chip_gen: v7x
topology: tpu7x:2x2x1
jax: 0.10.0
libtpu: 0.0.40
codegen_flags: <defaults>
</compile_context>

<pallas_src>
import functools

import jax
import jax.numpy as jnp
from jax.experimental import pallas as pl
from jax.experimental.pallas import tpu as pltpu


# --------------------------------------------------------------------------------------
# kernel
# --------------------------------------------------------------------------------------
def _window_attention_kernel(x_ref, wqkv_ref, bqkv_ref, bias_ref, head_mask_ref,
                             ones_blk_ref, wproj_ref, bproj_ref, o_ref,
                             *, num_heads, tb, n, compute_dtype):
    # x_ref:       (TB*N, C)     slab of TB windows, tokens flattened into rows
    # wqkv_ref:    (C, 3C)       fused QKV weight (qk scale folded into q columns)
    # bqkv_ref:    (1, 3C)       fused QKV bias (q part scaled), f32
    # bias_ref:    (TB*N, H*N)   rel-pos bias + window mask, lane-dense, grid-invariant
    # head_mask:   (H*N, C)      0/1: row block h <-> channel block h
    # ones_blk:    (H*N, H*N)    0/1: block-diagonal ones (per-head segmented sum)
    # wproj_ref:   (C, C), bproj_ref: (1, C)
    # o_ref:       (TB*N, C)
    rows, C = x_ref.shape
    H = num_heads
    HN = H * n

    x = x_ref[...].astype(compute_dtype)

    # ---- fused QKV projection: one big lane-dense MXU GEMM (+ f32 bias) ----
    qkv = jnp.dot(x, wqkv_ref[...], preferred_element_type=jnp.float32) + bqkv_ref[...]
    q2 = qkv[:, 0 * C:1 * C]                 # (rows, C); qk scale already folded in
    k2 = qkv[:, 1 * C:2 * C]
    v2 = qkv[:, 2 * C:3 * C]

    q3 = q2.reshape(tb, n, C)                # leading-dim splits: layout-preserving
    k3 = k2.reshape(tb, n, C)
    v3 = v2.reshape(tb, n, C)

    # ---- head-batched attention via block-diagonal K/V expansion ----
    # kbd/vbd[b, h*N + j, c] = k/v[b, j, c] if c belongs to head h else 0, so the scores
    # for all heads of a window come out of ONE batched matmul in lane-dense (N, H*N) form.
    head_mask = head_mask_ref[...]                              # (H*N, C)
    kbd = jnp.concatenate([k3] * H, axis=1) * head_mask         # (TB, H*N, C), f32
    vbd = jnp.concatenate([v3] * H, axis=1) * head_mask         # (TB, H*N, C), f32

    s = jnp.einsum('bqc,bmc->bqm', q3, kbd,
                   preferred_element_type=jnp.float32)          # (TB, N, H*N)
    s2 = s.reshape(rows, HN) + bias_ref[...]                    # + rel-pos bias + 0/-inf mask

    # ---- exact per-head softmax (all math f32) ----
    # segmented max: H masked full-lane reduces (H is tiny, static)
    lane = jax.lax.broadcasted_iota(jnp.int32, (1, HN), 1)
    neg = jnp.float32(-jnp.inf)
    m = jnp.zeros_like(s2)
    for h in range(H):
        in_h = (lane >= h * n) & (lane < (h + 1) * n)           # (1, HN)
        mh = jnp.max(jnp.where(in_h, s2, neg), axis=-1, keepdims=True)
        m = jnp.where(in_h, mh, m)
    p = jnp.exp(s2 - m)                                         # (rows, HN)
    # segmented sum via block-diagonal ones matmul (MXU is otherwise idle here)
    l = jnp.dot(p, ones_blk_ref[...], preferred_element_type=jnp.float32)
    attn = p * pl.reciprocal(l, approx=False)                   # exact softmax weights

    # ---- context: one batched matmul against the block-diagonal V ----
    ctx = jnp.einsum('bqm,bmc->bqc', attn.reshape(tb, n, HN), vbd,
                     preferred_element_type=jnp.float32)        # (TB, N, C)
    y = ctx.reshape(rows, C).astype(compute_dtype)

    out = jnp.dot(y, wproj_ref[...], preferred_element_type=jnp.float32) + bproj_ref[...]
    o_ref[...] = out.astype(o_ref.dtype)


# --------------------------------------------------------------------------------------
# slab sizing (padded-footprint aware)
# --------------------------------------------------------------------------------------
def _round_up(v, m):
    return (v + m - 1) // m * m


def _padded_row_bytes(c, dtype_bytes=4):
    return _round_up(c, 128) * dtype_bytes


def _choose_tb(B_, nW, N, C, H, vmem_budget_bytes):
    """Windows per grid step, chosen from a conservative *padded* VMEM footprint model
    (not nominal bytes), preferring the largest slab that still leaves an even grid of
    >= 4 steps so both v7x TensorCores stay busy."""
    rc = _padded_row_bytes(C)
    r3c = _padded_row_bytes(3 * C)
    rhn = _padded_row_bytes(H * N)
    resident = 2 * 2 * N * rc + 2 * N * rhn               # x/out slabs (x2 buf) + bias table (x2 buf)
    phase_proj = N * r3c + 3 * N * rc                     # qkv result + q/k/v slices
    phase_attn = N * rc + 2 * (H * N) * rc + 3 * N * rhn  # q + expanded K/V + score/prob temps
    per_window = resident + max(phase_proj, phase_attn) + 2 * N * rc   # + slack
    budget_windows = max(1, int(vmem_budget_bytes) // per_window)

    B = B_ // nW
    cands = []
    for g in range(1, B + 1):
        if B % g:
            continue
        tb = g * nW
        if tb != B_ and (tb * N) % 8:
            continue                                      # (8,128) sublane rule for partial blocks
        cands.append(tb)
    if not cands:
        cands = [B_]
    feas = [t for t in cands if t <= budget_windows] or [min(cands)]

    def best(pred):
        ok = [t for t in feas if pred(B_ // t)]
        return max(ok) if ok else None

    return (best(lambda nb: nb >= 4 and nb % 2 == 0)      # even, >=4 steps: both v7x TCs busy
            or best(lambda nb: nb >= 2)
            or max(feas))


# --------------------------------------------------------------------------------------
# wrapper
# --------------------------------------------------------------------------------------
def window_attention(x, params, window_size, num_heads, mask=None, qk_scale=None,
                     compute_dtype=jnp.float32,
                     vmem_budget_bytes=40 * 1024 * 1024,
                     vmem_limit_bytes=56 * 1024 * 1024):
    """Pallas implementation of WindowAttention.forward.

    x:    (B_, N, C) float32, B_ = num_windows * batch (window index fastest)
    mask: (nW, N, N) float32 additive 0/-inf mask, or None
    compute_dtype: dtype for the two projection GEMMs only (f32 default; bf16 optional on
                   v6e/v7x).  All attention / softmax math stays f32.
    vmem_budget_bytes / vmem_limit_bytes: defaults are v7x-safe (64 MiB physical VMEM).
                   On v5e/v6e (128 MiB) pass ~96 MiB / ~112 MiB for larger slabs.
    Precondition: every query row must have at least one unmasked key, otherwise the
    softmax produces NaN (same as the PyTorch reference).
    """
    B_, N, C = x.shape
    H = num_heads
    assert C % H == 0
    d = C // H
    scale = qk_scale if qk_scale is not None else d ** (-0.5)

    # --- relative position bias gather (tiny table lookup, wrapper-side) ------
    Wt = window_size[0]
    assert N == Wt
    coords = jnp.arange(Wt)
    rel_index = (coords[:, None] - coords[None, :]) + (Wt - 1)              # (Wt, Wt)
    rel_bias = params["rel_pos_table"][rel_index.reshape(-1)]               # (Wt*Wt, H)
    rel_bias = rel_bias.reshape(Wt, Wt, H).transpose(2, 0, 1).astype(jnp.float32)   # (H, N, N)

    if mask is None:
        nW = 1
        mask_arr = jnp.zeros((1, N, N), jnp.float32)
    else:
        nW = mask.shape[0]
        assert B_ % nW == 0
        mask_arr = mask.astype(jnp.float32)

    TB = _choose_tb(B_, nW, N, C, H, vmem_budget_bytes)
    # Mask-alignment precondition: every grid block must start at a window index that is a
    # multiple of nW, otherwise the grid-invariant bias table would be misaligned.
    assert TB % nW == 0 and B_ % TB == 0, (TB, nW, B_)
    num_blocks = B_ // TB
    rows = TB * N

    # --- one lane-dense additive table per block: bias_blk[w*N + q, h*N + j] --
    comb = rel_bias[None, :, :, :] + mask_arr[:, None, :, :]                # (nW, H, N, N)
    comb = jnp.transpose(comb, (0, 2, 1, 3)).reshape(nW, N, H * N)          # (nW, N, H*N)
    bias_blk = jnp.tile(comb, (TB // nW, 1, 1)).reshape(rows, H * N)        # (TB*N, H*N)

    # --- fused QKV weight with qk scale folded into the q columns -------------
    wqkv = params["wqkv"].astype(jnp.float32)                               # (C, 3C)
    bqkv = params["bqkv"].astype(jnp.float32)                               # (3C,)
    col_scale = jnp.concatenate([jnp.full((C,), scale, jnp.float32),
                                 jnp.ones((2 * C,), jnp.float32)])
    wqkv = (wqkv * col_scale[None, :]).astype(compute_dtype)
    bqkv = (bqkv * col_scale).reshape(1, 3 * C).astype(jnp.float32)
    wproj = params["wproj"].astype(compute_dtype)                           # (C, C)
    bproj = params["bproj"].reshape(1, C).astype(jnp.float32)

    # --- static head-structure matrices (tiny, grid-invariant) ----------------
    row_head = jnp.repeat(jnp.arange(H), N)                                 # (H*N,)
    col_head = jnp.repeat(jnp.arange(H), d)                                 # (C,)
    head_mask = (row_head[:, None] == col_head[None, :]).astype(jnp.float32)   # (H*N, C)
    ones_blk = (row_head[:, None] == row_head[None, :]).astype(jnp.float32)    # (H*N, H*N)

    x2d = x.reshape(B_ * N, C)

    kernel = functools.partial(_window_attention_kernel,
                               num_heads=H, tb=TB, n=N, compute_dtype=compute_dtype)

    # advisory cost estimate (useful FLOPs / bytes)
    flops = (2 * B_ * N * C * 3 * C          # fused qkv projection
             + 4 * B_ * H * N * N * d        # qk^T and attn@v
             + 2 * B_ * N * C * C)           # output projection
    bytes_accessed = int(
        B_ * N * C * 4 * 2                                   # x in + out
        + 4 * C * C * jnp.dtype(compute_dtype).itemsize      # weights
        + bias_blk.size * 4 + (H * N) * (C + H * N) * 4 + 4 * C * 4)
    cost = pl.CostEstimate(flops=flops, transcendentals=B_ * H * N * N,
                           bytes_accessed=bytes_accessed)

    out2d = pl.pallas_call(
        kernel,
        out_shape=jax.ShapeDtypeStruct((B_ * N, C), x.dtype),
        grid=(num_blocks,),
        in_specs=[
            pl.BlockSpec((rows, C), lambda i: (i, 0)),            # x slab
            pl.BlockSpec((C, 3 * C), lambda i: (0, 0)),           # fused Wqkv (q cols scaled)
            pl.BlockSpec((1, 3 * C), lambda i: (0, 0)),           # fused bqkv
            pl.BlockSpec((rows, H * N), lambda i: (0, 0)),        # lane-dense bias+mask table
            pl.BlockSpec((H * N, C), lambda i: (0, 0)),           # head mask (block-diag 0/1)
            pl.BlockSpec((H * N, H * N), lambda i: (0, 0)),       # block-diag ones
            pl.BlockSpec((C, C), lambda i: (0, 0)),               # Wproj
            pl.BlockSpec((1, C), lambda i: (0, 0)),               # bproj
        ],
        out_specs=pl.BlockSpec((rows, C), lambda i: (i, 0)),
        compiler_params=pltpu.CompilerParams(
            dimension_semantics=("parallel",),
            vmem_limit_bytes=int(vmem_limit_bytes)),
        cost_estimate=cost,
    )(x2d, wqkv, bqkv, bias_blk, head_mask, ones_blk, wproj, bproj)

    return out2d.reshape(B_, N, C)


# --------------------------------------------------------------------------------------
# pure-JAX reference (mirrors the PyTorch forward exactly)
# --------------------------------------------------------------------------------------
def window_attention_reference(x, params, window_size, num_heads, mask=None, qk_scale=None):
    B_, N, C = x.shape
    head_dim = C // num_heads
    scale = qk_scale if qk_scale is not None else head_dim ** (-0.5)

    qkv = x @ params["wqkv"] + params["bqkv"]                        # (B_, N, 3C)
    qkv = qkv.reshape(B_, N, 3, num_heads, head_dim).transpose(2, 0, 3, 1, 4)
    q, k, v = qkv[0], qkv[1], qkv[2]                                 # (B_, H, N, d)
    q = q * scale
    attn = jnp.einsum("bhnd,bhmd->bhnm", q, k)                       # (B_, H, N, N)

    Wt = window_size[0]
    coords = jnp.arange(Wt)
    rel_index = (coords[:, None] - coords[None, :]) + (Wt - 1)
    rel_bias = params["rel_pos_table"][rel_index.reshape(-1)].reshape(Wt, Wt, num_heads)
    rel_bias = rel_bias.transpose(2, 0, 1)                           # (H, Wt, Wt)
    attn = attn + rel_bias[None]

    if mask is not None:
        nW = mask.shape[0]
        attn = attn.reshape(B_ // nW, nW, num_heads, N, N) + mask[None, :, None]
        attn = attn.reshape(-1, num_heads, N, N)

    attn = jax.nn.softmax(attn, axis=-1)
    out = jnp.einsum("bhnm,bhmd->bhnd", attn, v)                     # (B_, H, N, d)
    out = out.transpose(0, 2, 1, 3).reshape(B_, N, C)
    out = out @ params["wproj"] + params["bproj"]
    return out


def init_params(key, dim, window_size, num_heads):
    k1, k2, k3, k4, k5, _ = jax.random.split(key, 6)
    # deterministic synthetic init; trunc_normal(std=0.02) approximated by normal*0.02
    return {
        "rel_pos_table": 0.02 * jax.random.normal(k1, (2 * window_size[0] - 1, num_heads), jnp.float32),
        "wqkv": 0.1 * jax.random.normal(k2, (dim, 3 * dim), jnp.float32),
        "bqkv": 0.1 * jax.random.normal(k3, (3 * dim,), jnp.float32),
        "wproj": 0.1 * jax.random.normal(k4, (dim, dim), jnp.float32),
        "bproj": 0.1 * jax.random.normal(k5, (dim,), jnp.float32),
    }


if __name__ == "__main__":
    dim = 32
    num_heads = 4
    window_size = (8,)
    N = window_size[0]
    nW = 2          # number of windows
    B = 2           # batch
    B_ = B * nW     # num_windows * batch

    key = jax.random.PRNGKey(0)
    kx, kp, km = jax.random.split(key, 3)

    x = jax.random.normal(kx, (B_, N, dim), jnp.float32)
    params = init_params(kp, dim, window_size, num_heads)

    # --- mask=None path (f32 compute, default) ---
    out = jax.block_until_ready(window_attention(x, params, window_size, num_heads, mask=None))
    ref = window_attention_reference(x, params, window_size, num_heads, mask=None)
    assert out.shape == (B_, N, dim)
    assert jnp.allclose(out, ref, atol=2e-3, rtol=2e-3), "mask=None mismatch"

    # --- shifted-window style additive mask path (0 / -inf values) ---
    raw = jax.random.bernoulli(km, 0.2, (nW, N, N))
    mask = jnp.where(raw, -jnp.inf, 0.0).astype(jnp.float32)
    # Precondition: no fully-masked rows (all -inf) -> would be NaN, same as PyTorch softmax.
    mask = mask.at[:, :, 0].set(0.0)
    out_m = jax.block_until_ready(
        window_attention(x, params, window_size, num_heads, mask=mask))
    ref_m = window_attention_reference(x, params, window_size, num_heads, mask=mask)
    assert jnp.allclose(out_m, ref_m, atol=2e-3, rtol=2e-3), "masked path mismatch"

    # --- optional bf16 projection path (v6e/v7x-oriented; attention math stays f32) ---
    out_bf = jax.block_until_ready(
        window_attention(x, params, window_size, num_heads, mask=mask,
                         compute_dtype=jnp.bfloat16))
    assert jnp.allclose(out_bf, ref_m, atol=5e-2, rtol=5e-2), "bf16 path mismatch"

    print("KERNEL_OK")
</pallas_src>

<mosaic_0001>
module attributes {stable_mosaic.version = 11 : i64} {
  func.func @_window_attention_kernel(%arg0: i32, %arg1: memref<8x32xf32, #tpu.memory_space<vmem>>, %arg2: memref<32x96xf32, #tpu.memory_space<vmem>>, %arg3: memref<1x96xf32, #tpu.memory_space<vmem>>, %arg4: memref<8x32xf32, #tpu.memory_space<vmem>>, %arg5: memref<32x32xf32, #tpu.memory_space<vmem>>, %arg6: memref<32x32xf32, #tpu.memory_space<vmem>>, %arg7: memref<32x32xf32, #tpu.memory_space<vmem>>, %arg8: memref<1x32xf32, #tpu.memory_space<vmem>>, %arg9: memref<8x32xf32, #tpu.memory_space<vmem>>) attributes {dimension_semantics = [#tpu.dimension_semantics<parallel>], iteration_bounds = array<i64: 4>, scalar_prefetch = 0 : i64, scratch_operands = 0 : i64, tpu.core_type = #tpu.core_type<tc>, window_params = [{transform_indices = @transform_0, window_bounds = array<i64: 8, 32>}, {pipeline_mode = #tpu.pipeline_mode<synchronous>, transform_indices = @transform_1, window_bounds = array<i64: 32, 96>}, {pipeline_mode = #tpu.pipeline_mode<synchronous>, transform_indices = @transform_2, window_bounds = array<i64: 1, 96>}, {pipeline_mode = #tpu.pipeline_mode<synchronous>, transform_indices = @transform_3, window_bounds = array<i64: 8, 32>}, {pipeline_mode = #tpu.pipeline_mode<synchronous>, transform_indices = @transform_4, window_bounds = array<i64: 32, 32>}, {pipeline_mode = #tpu.pipeline_mode<synchronous>, transform_indices = @transform_5, window_bounds = array<i64: 32, 32>}, {pipeline_mode = #tpu.pipeline_mode<synchronous>, transform_indices = @transform_6, window_bounds = array<i64: 32, 32>}, {pipeline_mode = #tpu.pipeline_mode<synchronous>, transform_indices = @transform_7, window_bounds = array<i64: 1, 32>}, {transform_indices = @transform_8, window_bounds = array<i64: 8, 32>}]} {
    %c0 = arith.constant 0 : index
    %c0_0 = arith.constant 0 : index
    %0 = vector.load %arg1[%c0, %c0_0] : memref<8x32xf32, #tpu.memory_space<vmem>>, vector<8x32xf32>
    %c0_1 = arith.constant 0 : index
    %c0_2 = arith.constant 0 : index
    %1 = vector.load %arg2[%c0_1, %c0_2] : memref<32x96xf32, #tpu.memory_space<vmem>>, vector<32x96xf32>
    %cst = arith.constant dense<0.000000e+00> : vector<8x96xf32>
    %2 = tpu.matmul %0, %1, %cst {dimension_numbers = #tpu.dot_dimension_numbers<[1], [0], [0], [1], [0, 0, 1, 1], [], []>} : vector<8x32xf32>, vector<32x96xf32>, vector<8x96xf32> -> vector<8x96xf32>
    %c0_3 = arith.constant 0 : index
    %c0_4 = arith.constant 0 : index
    %3 = vector.load %arg3[%c0_3, %c0_4] : memref<1x96xf32, #tpu.memory_space<vmem>>, vector<1x96xf32>
    %4 = vector.broadcast %3 : vector<1x96xf32> to vector<8x96xf32>
    %5 = arith.addf %2, %4 : vector<8x96xf32>
    %6 = vector.extract_strided_slice %5 {offsets = [0, 0], sizes = [8, 32], strides = [1, 1]} : vector<8x96xf32> to vector<8x32xf32>
    %7 = vector.extract_strided_slice %5 {offsets = [0, 32], sizes = [8, 32], strides = [1, 1]} : vector<8x96xf32> to vector<8x32xf32>
    %8 = vector.extract_strided_slice %5 {offsets = [0, 64], sizes = [8, 32], strides = [1, 1]} : vector<8x96xf32> to vector<8x32xf32>
    %9 = vector.shape_cast %6 : vector<8x32xf32> to vector<1x8x32xf32>
    %10 = vector.shape_cast %7 : vector<8x32xf32> to vector<1x8x32xf32>
    %11 = vector.shape_cast %8 : vector<8x32xf32> to vector<1x8x32xf32>
    %c0_5 = arith.constant 0 : index
    %c0_6 = arith.constant 0 : index
    %12 = vector.load %arg5[%c0_5, %c0_6] : memref<32x32xf32, #tpu.memory_space<vmem>>, vector<32x32xf32>
    %13 = tpu.concatenate %10, %10, %10, %10 in 1 : vector<1x8x32xf32>, vector<1x8x32xf32>, vector<1x8x32xf32>, vector<1x8x32xf32> -> vector<1x32x32xf32>
    %14 = vector.shape_cast %12 : vector<32x32xf32> to vector<1x32x32xf32>
    %15 = arith.mulf %13, %14 : vector<1x32x32xf32>
    %16 = tpu.concatenate %11, %11, %11, %11 in 1 : vector<1x8x32xf32>, vector<1x8x32xf32>, vector<1x8x32xf32>, vector<1x8x32xf32> -> vector<1x32x32xf32>
    %17 = vector.shape_cast %12 : vector<32x32xf32> to vector<1x32x32xf32>
    %18 = arith.mulf %16, %17 : vector<1x32x32xf32>
    "tpu.trace_start"() <{level = 10 : i32, message = "bqc,bmc->bqm"}> : () -> ()
    %cst_7 = arith.constant dense<0.000000e+00> : vector<1x8x32xf32>
    %19 = tpu.matmul %9, %15, %cst_7 {dimension_numbers = #tpu.dot_dimension_numbers<[2], [2], [1], [1], [0, 0, 0, 1, 1, 1], [0], [0]>} : vector<1x8x32xf32>, vector<1x32x32xf32>, vector<1x8x32xf32> -> vector<1x8x32xf32>
    "tpu.trace_stop"() : () -> ()
    %20 = vector.shape_cast %19 : vector<1x8x32xf32> to vector<8x32xf32>
    %c0_8 = arith.constant 0 : index
    %c0_9 = arith.constant 0 : index
    %21 = vector.load %arg4[%c0_8, %c0_9] : memref<8x32xf32, #tpu.memory_space<vmem>>, vector<8x32xf32>
    %22 = arith.addf %20, %21 : vector<8x32xf32>
    %23 = tpu.iota {dimensions = array<i32: 1>} : vector<1x32xi32>
    %cst_10 = arith.constant 0.000000e+00 : f32
    %24 = vector.broadcast %cst_10 : f32 to vector<8x32xf32>
    %c0_i32 = arith.constant 0 : i32
    %25 = vector.broadcast %c0_i32 : i32 to vector<1x32xi32>
    %26 = arith.cmpi sge, %23, %25 : vector<1x32xi32>
    %c8_i32 = arith.constant 8 : i32
    %27 = vector.broadcast %c8_i32 : i32 to vector<1x32xi32>
    %28 = arith.cmpi slt, %23, %27 : vector<1x32xi32>
    %29 = arith.andi %26, %28 : vector<1x32xi1>
    %cst_11 = arith.constant 0xFF800000 : f32
    %30 = vector.shape_cast %29 : vector<1x32xi1> to vector<1x32xi1>
    %31 = vector.broadcast %30 : vector<1x32xi1> to vector<8x32xi1>
    %32 = vector.broadcast %cst_11 : f32 to vector<8x32xf32>
    %33 = arith.select %31, %22, %32 : vector<8x32xi1>, vector<8x32xf32>
    %cst_12 = arith.constant dense<0xFF800000> : vector<8xf32>
    %34 = vector.multi_reduction <maximumf>, %33, %cst_12 [1] : vector<8x32xf32> to vector<8xf32>
    %35 = vector.shape_cast %34 : vector<8xf32> to vector<8x1xf32>
    %36 = vector.shape_cast %29 : vector<1x32xi1> to vector<1x32xi1>
    %37 = vector.broadcast %36 : vector<1x32xi1> to vector<8x32xi1>
    %38 = vector.shape_cast %35 : vector<8x1xf32> to vector<8x1xf32>
    %39 = vector.broadcast %38 : vector<8x1xf32> to vector<8x32xf32>
    %40 = arith.select %37, %39, %24 : vector<8x32xi1>, vector<8x32xf32>
    %c8_i32_13 = arith.constant 8 : i32
    %41 = vector.broadcast %c8_i32_13 : i32 to vector<1x32xi32>
    %42 = arith.cmpi sge, %23, %41 : vector<1x32xi32>
    %c16_i32 = arith.constant 16 : i32
    %43 = vector.broadcast %c16_i32 : i32 to vector<1x32xi32>
    %44 = arith.cmpi slt, %23, %43 : vector<1x32xi32>
    %45 = arith.andi %42, %44 : vector<1x32xi1>
    %cst_14 = arith.constant 0xFF800000 : f32
    %46 = vector.shape_cast %45 : vector<1x32xi1> to vector<1x32xi1>
    %47 = vector.broadcast %46 : vector<1x32xi1> to vector<8x32xi1>
    %48 = vector.broadcast %cst_14 : f32 to vector<8x32xf32>
    %49 = arith.select %47, %22, %48 : vector<8x32xi1>, vector<8x32xf32>
    %cst_15 = arith.constant dense<0xFF800000> : vector<8xf32>
    %50 = vector.multi_reduction <maximumf>, %49, %cst_15 [1] : vector<8x32xf32> to vector<8xf32>
    %51 = vector.shape_cast %50 : vector<8xf32> to vector<8x1xf32>
    %52 = vector.shape_cast %45 : vector<1x32xi1> to vector<1x32xi1>
    %53 = vector.broadcast %52 : vector<1x32xi1> to vector<8x32xi1>
    %54 = vector.shape_cast %51 : vector<8x1xf32> to vector<8x1xf32>
    %55 = vector.broadcast %54 : vector<8x1xf32> to vector<8x32xf32>
    %56 = arith.select %53, %55, %40 : vector<8x32xi1>, vector<8x32xf32>
    %c16_i32_16 = arith.constant 16 : i32
    %57 = vector.broadcast %c16_i32_16 : i32 to vector<1x32xi32>
    %58 = arith.cmpi sge, %23, %57 : vector<1x32xi32>
    %c24_i32 = arith.constant 24 : i32
    %59 = vector.broadcast %c24_i32 : i32 to vector<1x32xi32>
    %60 = arith.cmpi slt, %23, %59 : vector<1x32xi32>
    %61 = arith.andi %58, %60 : vector<1x32xi1>
    %cst_17 = arith.constant 0xFF800000 : f32
    %62 = vector.shape_cast %61 : vector<1x32xi1> to vector<1x32xi1>
    %63 = vector.broadcast %62 : vector<1x32xi1> to vector<8x32xi1>
    %64 = vector.broadcast %cst_17 : f32 to vector<8x32xf32>
    %65 = arith.select %63, %22, %64 : vector<8x32xi1>, vector<8x32xf32>
    %cst_18 = arith.constant dense<0xFF800000> : vector<8xf32>
    %66 = vector.multi_reduction <maximumf>, %65, %cst_18 [1] : vector<8x32xf32> to vector<8xf32>
    %67 = vector.shape_cast %66 : vector<8xf32> to vector<8x1xf32>
    %68 = vector.shape_cast %61 : vector<1x32xi1> to vector<1x32xi1>
    %69 = vector.broadcast %68 : vector<1x32xi1> to vector<8x32xi1>
    %70 = vector.shape_cast %67 : vector<8x1xf32> to vector<8x1xf32>
    %71 = vector.broadcast %70 : vector<8x1xf32> to vector<8x32xf32>
    %72 = arith.select %69, %71, %56 : vector<8x32xi1>, vector<8x32xf32>
    %c24_i32_19 = arith.constant 24 : i32
    %73 = vector.broadcast %c24_i32_19 : i32 to vector<1x32xi32>
    %74 = arith.cmpi sge, %23, %73 : vector<1x32xi32>
    %c32_i32 = arith.constant 32 : i32
    %75 = vector.broadcast %c32_i32 : i32 to vector<1x32xi32>
    %76 = arith.cmpi slt, %23, %75 : vector<1x32xi32>
    %77 = arith.andi %74, %76 : vector<1x32xi1>
    %cst_20 = arith.constant 0xFF800000 : f32
    %78 = vector.shape_cast %77 : vector<1x32xi1> to vector<1x32xi1>
    %79 = vector.broadcast %78 : vector<1x32xi1> to vector<8x32xi1>
    %80 = vector.broadcast %cst_20 : f32 to vector<8x32xf32>
    %81 = arith.select %79, %22, %80 : vector<8x32xi1>, vector<8x32xf32>
    %cst_21 = arith.constant dense<0xFF800000> : vector<8xf32>
    %82 = vector.multi_reduction <maximumf>, %81, %cst_21 [1] : vector<8x32xf32> to vector<8xf32>
    %83 = vector.shape_cast %82 : vector<8xf32> to vector<8x1xf32>
    %84 = vector.shape_cast %77 : vector<1x32xi1> to vector<1x32xi1>
    %85 = vector.broadcast %84 : vector<1x32xi1> to vector<8x32xi1>
    %86 = vector.shape_cast %83 : vector<8x1xf32> to vector<8x1xf32>
    %87 = vector.broadcast %86 : vector<8x1xf32> to vector<8x32xf32>
    %88 = arith.select %85, %87, %72 : vector<8x32xi1>, vector<8x32xf32>
    %89 = arith.subf %22, %88 : vector<8x32xf32>
    %90 = math.exp %89 : vector<8x32xf32>
    %c0_22 = arith.constant 0 : index
    %c0_23 = arith.constant 0 : index
    %91 = vector.load %arg6[%c0_22, %c0_23] : memref<32x32xf32, #tpu.memory_space<vmem>>, vector<32x32xf32>
    %cst_24 = arith.constant dense<0.000000e+00> : vector<8x32xf32>
    %92 = tpu.matmul %90, %91, %cst_24 {dimension_numbers = #tpu.dot_dimension_numbers<[1], [0], [0], [1], [0, 0, 1, 1], [], []>} : vector<8x32xf32>, vector<32x32xf32>, vector<8x32xf32> -> vector<8x32xf32>
    %93 = tpu.reciprocal %92 : vector<8x32xf32> -> vector<8x32xf32>
    %94 = arith.mulf %90, %93 : vector<8x32xf32>
    %95 = vector.shape_cast %94 : vector<8x32xf32> to vector<1x8x32xf32>
    "tpu.trace_start"() <{level = 10 : i32, message = "bqm,bmc->bqc"}> : () -> ()
    %cst_25 = arith.constant dense<0.000000e+00> : vector<1x8x32xf32>
    %96 = tpu.matmul %95, %18, %cst_25 {dimension_numbers = #tpu.dot_dimension_numbers<[2], [1], [1], [2], [0, 0, 0, 1, 1, 2], [0], [0]>} : vector<1x8x32xf32>, vector<1x32x32xf32>, vector<1x8x32xf32> -> vector<1x8x32xf32>
    "tpu.trace_stop"() : () -> ()
    %97 = vector.shape_cast %96 : vector<1x8x32xf32> to vector<8x32xf32>
    %c0_26 = arith.constant 0 : index
    %c0_27 = arith.constant 0 : index
    %98 = vector.load %arg7[%c0_26, %c0_27] : memref<32x32xf32, #tpu.memory_space<vmem>>, vector<32x32xf32>
    %cst_28 = arith.constant dense<0.000000e+00> : vector<8x32xf32>
    %99 = tpu.matmul %97, %98, %cst_28 {dimension_numbers = #tpu.dot_dimension_numbers<[1], [0], [0], [1], [0, 0, 1, 1], [], []>} : vector<8x32xf32>, vector<32x32xf32>, vector<8x32xf32> -> vector<8x32xf32>
    %c0_29 = arith.constant 0 : index
    %c0_30 = arith.constant 0 : index
    %100 = vector.load %arg8[%c0_29, %c0_30] : memref<1x32xf32, #tpu.memory_space<vmem>>, vector<1x32xf32>
    %101 = vector.broadcast %100 : vector<1x32xf32> to vector<8x32xf32>
    %102 = arith.addf %99, %101 : vector<8x32xf32>
    %c0_31 = arith.constant 0 : index
    %c0_32 = arith.constant 0 : index
    %103 = vector.load %arg9[%c0_31, %c0_32] : memref<8x32xf32, #tpu.memory_space<vmem>>, vector<8x32xf32>
    tpu.vector_store %arg9[%c0_31, %c0_32], %102 {strides = array<i32>} : memref<8x32xf32, #tpu.memory_space<vmem>>, vector<8x32xf32>,
    return
  }
  func.func @transform_0(%arg0: i32) -> (i32, i32) {
    %c0_i32 = arith.constant 0 : i32
    %c0_i32_0 = arith.constant 0 : i32
    return %arg0, %c0_i32 : i32, i32
  }
  func.func @transform_1(%arg0: i32) -> (i32, i32) {
    %c0_i32 = arith.constant 0 : i32
    %c0_i32_0 = arith.constant 0 : i32
    %c0_i32_1 = arith.constant 0 : i32
    return %c0_i32, %c0_i32_0 : i32, i32
  }
  func.func @transform_2(%arg0: i32) -> (i32, i32) {
    %c0_i32 = arith.constant 0 : i32
    %c0_i32_0 = arith.constant 0 : i32
    %c0_i32_1 = arith.constant 0 : i32
    return %c0_i32, %c0_i32_0 : i32, i32
  }
  func.func @transform_3(%arg0: i32) -> (i32, i32) {
    %c0_i32 = arith.constant 0 : i32
    %c0_i32_0 = arith.constant 0 : i32
    %c0_i32_1 = arith.constant 0 : i32
    return %c0_i32, %c0_i32_0 : i32, i32
  }
  func.func @transform_4(%arg0: i32) -> (i32, i32) {
    %c0_i32 = arith.constant 0 : i32
    %c0_i32_0 = arith.constant 0 : i32
    %c0_i32_1 = arith.constant 0 : i32
    return %c0_i32, %c0_i32_0 : i32, i32
  }
  func.func @transform_5(%arg0: i32) -> (i32, i32) {
    %c0_i32 = arith.constant 0 : i32
    %c0_i32_0 = arith.constant 0 : i32
    %c0_i32_1 = arith.constant 0 : i32
    return %c0_i32, %c0_i32_0 : i32, i32
  }
  func.func @transform_6(%arg0: i32) -> (i32, i32) {
    %c0_i32 = arith.constant 0 : i32
    %c0_i32_0 = arith.constant 0 : i32
    %c0_i32_1 = arith.constant 0 : i32
    return %c0_i32, %c0_i32_0 : i32, i32
  }
  func.func @transform_7(%arg0: i32) -> (i32, i32) {
    %c0_i32 = arith.constant 0 : i32
    %c0_i32_0 = arith.constant 0 : i32
    %c0_i32_1 = arith.constant 0 : i32
    return %c0_i32, %c0_i32_0 : i32, i32
  }
  func.func @transform_8(%arg0: i32) -> (i32, i32) {
    %c0_i32 = arith.constant 0 : i32
    %c0_i32_0 = arith.constant 0 : i32
    return %arg0, %c0_i32 : i32, i32
  }
}

</mosaic_0001>

<bundles_post_ra>
// kernel: tpu_custom_call.1
= control target key start
LH: loop header
LB: loop body
LE: loop exit
PB: predicated region body
PF: predicated region fallthrough
CT: control target
= control target key end

     0   :  { %s1955_s0 = inlined_call_operand.hbm [shape: f32[32,32], index: 0, kind: input, shape index: {}]   ;;  %s1956_s1 = inlined_call_operand.hbm [shape: f32[32,96], index: 1, kind: input, shape index: {}]   ;;  %s1957_s2 = inlined_call_operand.vmem [shape: f32[1,96], index: 2, kind: input, shape index: {}]   ;;  %s1958_s3 = inlined_call_operand.vmem [shape: f32[8,32], index: 3, kind: input, shape index: {}]   ;;  %s1959_s4 = inlined_call_operand.hbm [shape: f32[32,32], index: 4, kind: input, shape index: {}]   ;;  %s1960_s5 = inlined_call_operand.hbm [shape: f32[32,32], index: 5, kind: input, shape index: {}]   ;;  %s1961_s6 = inlined_call_operand.hbm [shape: f32[32,32], index: 6, kind: input, shape index: {}]   ;;  %s1962_s7 = inlined_call_operand.vmem [shape: f32[1,32], index: 7, kind: input, shape index: {}]   ;;  %s1963_s8 = inlined_call_operand.hbm [shape: f32[32,32], index: 8, kind: output, shape index: {}]  }
   0x1   :  { %1967 = sst [smem:[#allocation16_spill]] %s1956_s1 }
   0x2   :  { %13 = vsyncpa [#allocation3], 0 }
   0x3   :  { %15 = vsyncpa [#allocation3 + $0x1], 0 }
   0x4   :  { %16 = vsyncpa [#allocation6], 0 }
   0x5   :  { %17 = vsyncpa [#allocation9], 0 }
   0x6   :  { %18 = vsyncpa [#allocation4], 0 }
   0x7   :  { %20 = vsyncpa [#allocation4 + $0x1], 0  ;;  %s1558_s27 = smov 0   ;;  %s1560_s28 = smov 0  }
   0x8   :  { %s1562_s29 = smov 0   ;;  %s1564_s30 = smov 0  }
   0x9 LB: > { %s1499_s9 = smov [#allocation5]   ;;  %s1579_s11 = sadd.s32 4294967295, %s1497_s30   ;;  %s1497_s30 = sphi %s1564_s30, %s1994_s30   ;;  %s1493_s29 = sphi %s1562_s29, %s1993_s29   ;;  %s1489_s28 = sphi %s1560_s28, %s1992_s28   ;;  %s1485_s27 = sphi %s1558_s27, %s1991_s27  }
   0xa   : > { %s242_s10 = sshll.u32 %s1499_s9, 4  ;;  %p1020_p0 = scmp.ge.s32.totalorder %s1497_s30, 1  ;;  %s1584_s10 = int_to_ptr.vmem [resolvable:$true] %s242_s10 }
   0xb   : > { %p1964_p1 = scmp.eq.s32.totalorder %s1579_s11, 0  ;;  %p230_p2 = scmp.lt.s32.totalorder %s1497_s30, 5 }
   0xc   : > { %s1500_s13 = smov [#allocation8]   ;;  %s1501_s16 = smov [#allocation7]  }
   0xd   : > { %p1586_p3 = pnand %p1020_p0, %p230_p2  ;;  %s274_s14 = sshll.u32 %s1500_s13, 4  ;;  %s1598_s14 = int_to_ptr.vmem [resolvable:$true] %s274_s14 }
   0xe   : > { %s261_s17 = sshll.u32 %s1501_s16, 4  ;;  %s1970_s1 = sld [smem:[#allocation16_spill]]  ;;  %s1600_s17 = int_to_ptr.vmem [resolvable:$true] %s261_s17 }
   0xf   : > { %s1968_s12 = scalar_select %p1586_p3, 1, 0 }
  0x10   : > { %p1182_p4 = pneg %p1586_p3 }
  0x12   : > { %p1594_p5 = pnand %p1182_p4, %p1964_p1 }
  0x14   : > { %s1281_s20 = scalar_lea.hbm %s1970_s1, 512  ;;  %p1610_p7 = pneg %p1594_p5 }
  0x15   : > { %p1282_p6 = scmp.ne.s32.totalorder %s1970_s1, %s1281_s20  ;;  %p1288_p10 = scmp.lt.u32.totalorder %s1281_s20, %s1970_s1 }
  0x17   : > { %p1284_p8 = pnand %p1610_p7, %p1282_p6 }
  0x19   : > { %p1285_p9 = pneg %p1284_p8 }
  0x1b   : > { %p1290_p11 = pnand %p1288_p10, %p1285_p9 }
  0x1d   : > { %1293 = shalt.err (!%p1290_p11)
}
  0x1e   : > { %s1294_s26 = scalar_lea.vmem %s1584_s10, 512  ;;  %p1302_p2 = scmp.lt.s32.totalorder %s1584_s10, %s1584_s10 }
  0x1f   : > { %p1295_p12 = scmp.ne.s32.totalorder %s1584_s10, %s1294_s26  ;;  %p1303_p4 = scmp.lt.s32.totalorder %s1294_s26, %s1294_s26 }
  0x21   : > { %p1297_p13 = pnand %p1295_p12, %p1610_p7  ;;  %p1304_p6 = por %p1303_p4, %p1302_p2 }
  0x23   : > { %p1298_p0 = pneg %p1297_p13 }
  0x25   : > { %p1305_p8 = pnand %p1304_p6, %p1298_p0 }
  0x27   : > { %1308 = shalt.err (!%p1305_p8)
}
  0x28   : > { %s1502_s9 = smov 128   ;;  %s1503_s13 = smov 8  }
  0x29   : > { %1185 = dma.hbm_to_vmem [thread:$0]  (!%p1594_p5), %s1970_s1, 512, %s1584_s10, [#allocation6], %s1502_s9, %s1502_s9, %s1503_s13  }
  0x2a   : > { %s1309_s21 = scalar_lea.hbm %s1960_s5, 512 }
  0x2b   : > { %p1310_p9 = scmp.ne.s32.totalorder %s1960_s5, %s1309_s21  ;;  %p1316_p12 = scmp.lt.u32.totalorder %s1309_s21, %s1960_s5 }
  0x2d   : > { %p1312_p10 = pnand %p1310_p9, %p1610_p7 }
  0x2f   : > { %p1313_p11 = pneg %p1312_p10 }
  0x31   : > { %p1318_p13 = pnand %p1316_p12, %p1313_p11 }
  0x33   : > { %1321 = shalt.err (!%p1318_p13)
}
  0x34   : > { %s1322_s10 = scalar_lea.vmem %s1598_s14, 512  ;;  %p1330_p6 = scmp.lt.s32.totalorder %s1598_s14, %s1598_s14 }
  0x35   : > { %p1323_p0 = scmp.ne.s32.totalorder %s1598_s14, %s1322_s10  ;;  %p1331_p8 = scmp.lt.s32.totalorder %s1322_s10, %s1322_s10 }
  0x37   : > { %p1325_p2 = pnand %p1323_p0, %p1610_p7  ;;  %p1332_p9 = por %p1331_p8, %p1330_p6 }
  0x39   : > { %p1326_p4 = pneg %p1325_p2 }
  0x3b   : > { %p1333_p10 = pnand %p1332_p9, %p1326_p4 }
  0x3d   : > { %1336 = shalt.err (!%p1333_p10)
}
  0x3e   : > { %1191 = dma.hbm_to_vmem [thread:$0]  (!%p1594_p5), %s1960_s5, 512, %s1598_s14, [#allocation9], %s1502_s9, %s1502_s9, %s1503_s13  }
  0x3f   : > { %s1337_s21 = scalar_lea.hbm %s1959_s4, 512 }
  0x40   : > { %p1338_p11 = scmp.ne.s32.totalorder %s1959_s4, %s1337_s21  ;;  %p1344_p0 = scmp.lt.u32.totalorder %s1337_s21, %s1959_s4 }
  0x42   : > { %p1340_p12 = pnand %p1338_p11, %p1610_p7 }
  0x44   : > { %p1341_p13 = pneg %p1340_p12 }
  0x46   : > { %p1346_p2 = pnand %p1344_p0, %p1341_p13 }
  0x48   : > { %1349 = shalt.err (!%p1346_p2)
}
  0x49   : > { %s1350_s14 = scalar_lea.vmem %s1600_s17, 512  ;;  %p1358_p9 = scmp.lt.s32.totalorder %s1600_s17, %s1600_s17 }
  0x4a   : > { %p1351_p4 = scmp.ne.s32.totalorder %s1600_s17, %s1350_s14  ;;  %p1359_p10 = scmp.lt.s32.totalorder %s1350_s14, %s1350_s14 }
  0x4c   : > { %p1353_p6 = pnand %p1351_p4, %p1610_p7  ;;  %p1360_p11 = por %p1359_p10, %p1358_p9 }
  0x4e   : > { %p1354_p8 = pneg %p1353_p6 }
  0x50   : > { %p1361_p12 = pnand %p1360_p11, %p1354_p8 }
  0x52   : > { %1364 = shalt.err (!%p1361_p12)
}
  0x53   : > { %1188 = dma.hbm_to_vmem [thread:$0]  (!%p1594_p5), %s1959_s4, 512, %s1600_s17, [#allocation6], %s1502_s9, %s1502_s9, %s1503_s13  }
  0x54   : > { %s1504_s18 = smov [#allocation10]   ;;  %s1365_s22 = scalar_lea.hbm %s1961_s6, 512 }
  0x55   : > { %s287_s19 = sshll.u32 %s1504_s18, 4  ;;  %p1366_p13 = scmp.ne.s32.totalorder %s1961_s6, %s1365_s22  ;;  %s288_s19 = int_to_ptr.vmem [resolvable:$true] %s287_s19 }
  0x56   : > { %p1372_p4 = scmp.lt.u32.totalorder %s1365_s22, %s1961_s6 }
  0x57   : > { %p1368_p0 = pnand %p1366_p13, %p1610_p7 }
  0x59   : > { %p1369_p2 = pneg %p1368_p0 }
  0x5b   : > { %p1374_p6 = pnand %p1372_p4, %p1369_p2 }
  0x5d   : > { %1377 = shalt.err (!%p1374_p6)
}
  0x5e   : > { %s1378_s17 = scalar_lea.vmem %s288_s19, 512  ;;  %p1386_p11 = scmp.lt.s32.totalorder %s288_s19, %s288_s19 }
  0x5f   : > { %p1379_p8 = scmp.ne.s32.totalorder %s288_s19, %s1378_s17  ;;  %p1387_p12 = scmp.lt.s32.totalorder %s1378_s17, %s1378_s17 }
  0x61   : > { %p1381_p9 = pnand %p1379_p8, %p1610_p7  ;;  %p1388_p1 = por %p1387_p12, %p1386_p11 }
  0x63   : > { %p1382_p10 = pneg %p1381_p9 }
  0x65   : > { %p1389_p3 = pnand %p1388_p1, %p1382_p10 }
  0x67   : > { %1392 = shalt.err (!%p1389_p3)
}
  0x68   : > { %1194 = dma.hbm_to_vmem [thread:$0]  (!%p1594_p5), %s1961_s6, 512, %s288_s19, [#allocation9], %s1502_s9, %s1502_s9, %s1503_s13  }
  0x69   : > { %s1019_s15 = sadd.s32 4294967294, %s1497_s30   ;;  %s1709_s23 = sadd.s32 1, %s1497_s30  }
  0x6a   : > { %s30_s18 = ssub.s32 %s1497_s30, %s1709_s23  ;;  %s33_s20 = sadd.s32 1, %s1493_s29 }
  0x6b   : > { %p31_p1 = scmp.eq.s32.totalorder %s30_s18, 0  ;;  %p40_p3 = scmp.ne.s32.totalorder %s1493_s29, %s1489_s28 }
  0x6c   : > { %p41_p7 = scmp.eq.s32.totalorder %s1497_s30, 0  ;;  %p46_p13 = scmp.ne.s32.totalorder %s1489_s28, %s1485_s27 }
  0x6d   : > { %s1720_s21 = scalar_select %p31_p1, %s1493_s29, %s33_s20  }
  0x6e   : > { %p1722_p0 = por %p41_p7, %p40_p3  ;;  %p1973_p2 = scmp.eq.s32.totalorder %s1579_s11, 0 }
  0x6f   : > { %p217_p4 = scmp.eq.s32.totalorder %s1579_s11, 3  ;;  %p223_p6 = scmp.eq.s32.totalorder %s1019_s15, 3 }
  0x70   : > { %p1728_p5 = por %p1973_p2, %p46_p13  ;;  %p1207_p8 = scmp.lt.s32.totalorder %s1497_s30, 4 }
  0x71   : > { %s304_s13 = sand.u32 1, %s1493_s29   ;;  %p1735_p9 = por %p217_p4, %p40_p3 }
  0x72   : > { %p1739_p10 = por %p223_p6, %p46_p13  ;;  %s1026_s25 = sshll.u32 %s304_s13, 3 }
  0x73   : > { %s1975_s19 = scalar_select %p1735_p9, 1, 0 }
  0x74   : > { %s1976_s24 = scalar_select %p1739_p10, 1, 0 }
  0x75   : > { %s1027_s26 = sshll.u32 %s1497_s30, 7  ;;  %s308_s16 = scalar_lea.vmem [#allocation2], %s1026_s25 }
  0x76   : > { %s1747_s10 = scalar_lea.hbm %s1955_s0, %s1027_s26  ;;  %s315_s15 = sshll.u32 %s308_s16, 4  ;;  %s1749_s15 = int_to_ptr.vmem [resolvable:$true] %s315_s15 }
  0x77   : > { %p1753_p11 = pnand %p1207_p8, %p1722_p0  ;;  %s305_s20 = scalar_lea.sflag [#allocation3], %s304_s13 }
  0x78   : > { %s1393_s1 = scalar_lea.hbm %s1747_s10, 128  ;;  %s1398_s14 = scalar_lea.hbm %s1955_s0, 512 }
  0x79   : > { %p1394_p12 = scmp.ne.s32.totalorder %s1747_s10, %s1393_s1  ;;  %p1395_p1 = pneg %p1753_p11 }
  0x7a   : > { %p1399_p13 = scmp.lt.u32.totalorder %s1747_s10, %s1955_s0  ;;  %p1400_p0 = scmp.lt.u32.totalorder %s1398_s14, %s1393_s1 }
  0x7b   : > { %p1396_p3 = pnand %p1395_p1, %p1394_p12  ;;  %p1402_p4 = scmp.lt.u32.totalorder %s1393_s1, %s1747_s10 }
  0x7c   : > { %p1401_p2 = por %p1400_p0, %p1399_p13 }
  0x7d   : > { %p1397_p7 = pneg %p1396_p3 }
  0x7e   : > { %p1403_p6 = por %p1402_p4, %p1401_p2 }
  0x80   : > { %p1404_p8 = pnand %p1403_p6, %p1397_p7 }
  0x82   : > { %1407 = shalt.err (!%p1404_p8)
}
  0x83   : > { %s1408_s13 = scalar_lea.vmem %s1749_s15, 128  ;;  %s1505_s16 = smov [#allocation2]  }
  0x84   : > { %p1409_p12 = scmp.ne.s32.totalorder %s1749_s15, %s1408_s13  ;;  %s1413_s25 = sshll.u32 %s1505_s16, 4  ;;  %s1414_s25 = int_to_ptr.vmem [resolvable:$false] %s1413_s25 }
  0x85   : > { %s1415_s26 = scalar_lea.vmem %s1414_s25, 256  ;;  %p1416_p9 = scmp.lt.s32.totalorder %s1749_s15, %s1414_s25 }
  0x86   : > { %p1411_p3 = pnand %p1409_p12, %p1395_p1  ;;  %p1417_p13 = scmp.lt.s32.totalorder %s1415_s26, %s1408_s13 }
  0x88   : > { %p1412_p10 = pneg %p1411_p3  ;;  %p1418_p0 = por %p1417_p13, %p1416_p9 }
  0x8a   : > { %p1419_p2 = pnand %p1418_p0, %p1412_p10 }
  0x8c   : > { %1422 = shalt.err (!%p1419_p2)
}
  0x8d   : > { %1198 = dma.hbm_to_vmem [thread:$0]  (!%p1753_p11), %s1747_s10, 128, %s1749_s15, %s305_s20  }
  0x8e   : > { %p1978_p7 = scmp.ne.s32.totalorder %s1968_s12, 0 }
  0x8f   : > { %s1785_s1 = sand.u32 (!%p1978_p7), 1, %s1489_s28  }
  0x90   : > { %324 = sbr.rel (%p1978_p7) target bundleno = 1567 (0x61f), region = 52  ;;  %s1029_s14 = sshll.u32 (!%p1978_p7), %s1785_s1, 3 }
  0x91   : > { %s327_s22 = scalar_lea.sflag (!%p1978_p7), [#allocation3], %s1785_s1  ;;  %s1791_s17 = scalar_lea.vmem (!%p1978_p7), [#allocation2], %s1029_s14 }
  0x97   : > { %1468 = dma.done.wait (%p1728_p5), %s327_s22, 128  }
  0x98   : > { %1470 = vsyncadd (%p1728_p5), %s327_s22, 4294967168  ;;  %p1979_p9 = scmp.eq.s32.totalorder %s1579_s11, 0 }
  0x9a   : > { %1472 = dma.done.wait (%p1979_p9), [#allocation6], 1024   ;;  %p1980_p10 = pmov %p1979_p9 }
  0x9b   : > { %p1981_p11 = pmov %p1979_p9 }
  0x9c   : > { %1474 = vsyncadd (%p1980_p10), [#allocation6], 4294966272 }
  0x9d   : > { %1476 = dma.done.wait (%p1981_p11), [#allocation9], 1024   ;;  %p1982_p1 = pmov %p1979_p9 }
  0x9e   : > { %v1506_v0 = vmov 0.0|0.0   ;;  %vm1507_vm0 = vmmov 0   ;;  %v1508_v1 = vmov 0.0   ;;  %v380_v2 = vld [vmem:[#allocation5] sm:$0xff]  ;;  %v381_v3 = vld [vmem:[#allocation5 + $0x8] sm:$0xff]  ;;  %v382_v4 = vld [vmem:[#allocation5 + $0x10] sm:$0xff]  ;;  %v599_v35 = vlaneseq }
  0x9f   : > { %1478 = vsyncadd (%p1982_p1), [#allocation9], 4294966272  ;;  %1130 = vmatprep.subr.bf16.mxu0 %v1506_v0  ;;  %1083 = vmatprep.mubr.msk.f32.mxu0 %vm1507_vm0, %v1508_v1  ;;  %v1131_v5 = vpack.c.bf16 %v381_v3, %v380_v2  ;;  %v383_v6 = vld [vmem:[#allocation5 + $0x18] sm:$0xff]  ;;  %v1811_v7 = vld [vmem:[#allocation7 + $0x10] sm:$0xff]  ;;  %s1509_s12 = smov 32   ;;  %vm391_vm1 = vcmask 261120  }
  0xa0   : > { %1136 = vmatprep.subr.bf16.mxu1 %v1506_v0  ;;  %1094 = vmatprep.mubr.msk.f32.mxu1 %vm1507_vm0, %v1508_v1  ;;  %v1814_v8 = vld [vmem:[#allocation7] sm:$0xff]  ;;  %v1134_v9 = vpack.c.bf16 %v383_v6, %v382_v4  ;;  %v1817_v10 = vld [vmem:[#allocation7 + $0x18] sm:$0xff]  ;;  %v1820_v11 = vld [vmem:[#allocation7 + $0x8] sm:$0xff]  ;;  %s1510_s15 = smov 96   ;;  %v600_v36 = vand.u32 127, %v599_v35  ;;  %s1511_s13 = smov 64  }
  0xa1   : > { %477 = vrot.lane.b32.xlu1 %v1811_v7, %s1509_s12  ;;  %1132 = vmatpush3.bf16.msra.mxu0 %v1131_v5  ;;  %v379_v12 = vld [vmem:[%s1791_s17] sm:$0xff]  ;;  %vm1138_vm2 = vmpackc.low %vm391_vm1, %vm391_vm1  ;;  %v644_v52 = vld [vmem:[#allocation8] sm:$0xff]  ;;  %s1047_s26 = sshll.u32 %s1579_s11, 7  ;;  %s378_s22 = scalar_lea.vmem [#allocation11], %s1029_s14 }
  0xa2   : > { %473 = vrot.lane.b32.xlu0 %v1814_v8, %s1509_s12  ;;  %1133 = vmatprep.subr.bf16.mxu0 %v1506_v0  ;;  %v1035_v15 = vld [vmem:[%s1957_s2] ss:$0 sm:$0xff]  ;;  %vm611_vm3 = vcmp.ge.s32.totalorder %v600_v36, 8  ;;  %vm612_vm4 = vcmp.lt.s32.totalorder %v600_v36, 16  ;;  %vm621_vm5 = vcmp.ge.s32.totalorder %v600_v36, 16  ;;  %vm622_vm6 = vcmp.lt.s32.totalorder %v600_v36, 24  ;;  %s1911_s10 = scalar_lea.hbm %s1963_s8, %s1047_s26 }
  0xa3   : > { %v505_v37 = vld [vmem:[%s1958_s3] sm:$0xff]  ;;  %vm1849_vm7 = vmand %vm611_vm3, %vm612_vm4  ;;  %vm602_vm8 = vcmp.lt.s32.totalorder %v600_v36, 8  ;;  %vm631_vm10 = vcmp.ge.s32.totalorder %v600_v36, 24  ;;  %vm632_vm11 = vcmp.lt.s32.totalorder %v600_v36, 32  ;;  %v645_v53 = vld [vmem:[#allocation8 + $0x8] sm:$0xff]  ;;  %s911_s17 = sshll.u32 %s378_s22, 4  ;;  %s1913_s17 = int_to_ptr.vmem [resolvable:$true] %s911_s17 }
  0xa4   : > { %vm1853_vm9 = vmand %vm621_vm5, %vm622_vm6  ;;  %v1145_v54 = vpack.c.bf16 %v645_v53, %v644_v52  ;;  %v646_v55 = vld [vmem:[#allocation8 + $0x10] sm:$0xff]  ;;  %v647_v56 = vld [vmem:[#allocation8 + $0x18] sm:$0xff]  ;;  %s1423_s11 = scalar_lea.vmem %s1913_s17, 128  ;;  %p1989_p4 = scmp.ne.s32.totalorder %s1975_s19, 0 }
  0xa5   : > { %479 = vrot.lane.b32.xlu1 %v1817_v10, %s1509_s12  ;;  %1135 = vmatpush3.bf16.msra.mxu0 %v1134_v9  ;;  %vm1864_vm12 = vmand %vm631_vm10, %vm632_vm11  ;;  %v1148_v57 = vpack.c.bf16 %v647_v56, %v646_v55  ;;  %v1044_v36 = vld [vmem:[%s1962_s7] ss:$0 sm:$0xff]  ;;  %p1424_p5 = scmp.ne.s32.totalorder %s1913_s17, %s1423_s11  ;;  %s1512_s14 = smov [#allocation11]  }
  0xa6   : > { %475 = vrot.lane.b32.xlu0 %v1820_v11, %s1509_s12  ;;  %1144 = vmatprep.subr.bf16.mxu0 %v1506_v0  ;;  %s1427_s18 = sshll.u32 %s1512_s14, 4  ;;  %s1428_s18 = int_to_ptr.vmem [resolvable:$false] %s1427_s18 }
  0xa7   : > { %p1425_p6 = pnand %p1424_p5, %p1989_p4  ;;  %s1429_s20 = scalar_lea.vmem %s1428_s18, 256 }
  0xa8   : > { %1084 = vmatmul.mubr.msk.f32.vlgmr.msra.gmra.mrb[0].mxu0 %vm391_vm1, %v379_v12  ;;  %p1430_p12 = scmp.lt.s32.totalorder %s1913_s17, %s1428_s18  ;;  %p1431_p3 = scmp.lt.s32.totalorder %s1429_s20, %s1423_s11 }
  0xa9   : > { %1105 = vmatprep.mubr.msk.f32.mxu0 %vm1507_vm0, %v1508_v1  ;;  %1146 = vmatpush3.bf16.msra.mxu0 %v1145_v54  ;;  %p1426_p8 = pneg %p1425_p6 }
  0xaa   : > { %1147 = vmatprep.subr.bf16.mxu0 %v1506_v0  ;;  %p1432_p13 = por %p1431_p3, %p1430_p12 }
  0xac   : > { %p1433_p0 = pnand %p1432_p13, %p1426_p8 }
  0xad   : > { %1149 = vmatpush3.bf16.msra.mxu0 %v1148_v57 }
  0xae   : > { %1150 = vmatprep.subr.bf16.mxu0 %v1506_v0 }
 0x113   : > { %v478_v13 = vpop.permute.xlu1 %477 }
 0x114   : > { %v474_v14 = vpop.permute.xlu0 %473 }
 0x117   : > { %v480_v16 = vpop.permute.xlu1 %479 }
 0x118   : > { %v476_v18 = vpop.permute.xlu0 %475 }
 0x17b   : > { %v461_v17 = vpop.f32.mrb[0].mxu0 }
 0x17c   : > { %v1832_v19 = vadd.f32 %v1035_v15, %v461_v17  ;;  %v1085_v20 = vpop.f32.mrb[1].mxu0  ;;  %v812_v17 = vld [vmem:[#allocation10] sm:$0xff] }
 0x17d   : > { %v814_v20 = vld [vmem:[#allocation10 + $0x10] sm:$0xff] }
 0x17e   : > { %v487_v21 = vmul.f32 %v478_v13, %v1832_v19  ;;  %v488_v22 = vmul.f32 %v480_v16, %v1832_v19  ;;  %v485_v23 = vmul.f32 %v474_v14, %v1832_v19  ;;  %v486_v24 = vmul.f32 %v476_v18, %v1832_v19  ;;  %v813_v18 = vld [vmem:[#allocation10 + $0x8] sm:$0xff] }
 0x180   : > { %v1262_v25 = vpack.i.bf16 %v488_v22, %v487_v21  ;;  %v1257_v26 = vpack.i.bf16 %v486_v24, %v485_v23  ;;  %v1157_v21 = vpack.c.bf16 %v813_v18, %v812_v17  ;;  %v815_v22 = vld [vmem:[#allocation10 + $0x18] sm:$0xff] }
 0x182   : > { %1263 = vrot.lane.b32.xlu1 %v1262_v25, %s1510_s15  ;;  %1258 = vrot.lane.b32.xlu0 %v1257_v26, %s1510_s15  ;;  %s898_s15 = scalar_lea.sflag [#allocation4], %s1785_s1 }
 0x1f4   : > { %v1259_v27 = vpop.permute.xlu0 %1258  ;;  %v1264_v31 = vpop.permute.xlu1 %1263 }
 0x1f5   : > { %v1261_v28 = vunpack.i.h.bf16 %v1259_v27  ;;  %v1260_v29 = vunpack.i.l.bf16 %v1259_v27  ;;  %v1266_v32 = vunpack.i.h.bf16 %v1264_v31  ;;  %v1265_v33 = vunpack.i.l.bf16 %v1264_v31 }
 0x1f7   : > { %v1137_v30 = vpack.c.bf16 %v1261_v28, %v1260_v29  ;;  %v1141_v34 = vpack.c.bf16 %v1266_v32, %v1265_v33 }
 0x1f9   : > { %1139 = vmatpush3.bf16.xpose.msk.msra.mxu1 %vm1138_vm2, %v1137_v30 }
 0x1fa   : > { %1140 = vmatprep.subr.bf16.mxu1 %v1506_v0 }
 0x201   : > { %1143 = vmatpush3.bf16.xpose.msk.msra.mxu1 %vm1138_vm2, %v1141_v34 }
 0x202   : > { %1156 = vmatprep.subr.bf16.mxu1 %v1506_v0 }
 0x208   : > { %1095 = vmatmul.mubr.msk.f32.vlgmr.msra.gmra.mrb[0].mxu1 %vm391_vm1, %v1832_v19 }
 0x209   : > { %1127 = vmatprep.mubr.msk.f32.mxu1 %vm1507_vm0, %v1508_v1  ;;  %1158 = vmatpush3.bf16.msra.mxu1 %v1157_v21 }
 0x20a   : > { %1159 = vmatprep.subr.bf16.mxu1 %v1506_v0 }
 0x2db   : > { %v595_v38 = vpop.f32.mrb[0].mxu1 }
 0x2dc   : > { %v596_v40 = vadd.f32 %v595_v38, %v505_v37  ;;  %v1096_v41 = vpop.f32.mrb[1].mxu1 }
 0x2de   : > { %v616_v43 = vsel %vm1849_vm7, %v596_v40, -inf  ;;  %v606_v44 = vsel %vm602_vm8, %v596_v40, -inf  ;;  %v626_v47 = vsel %vm1853_vm9, %v596_v40, -inf  ;;  %v636_v50 = vsel %vm1864_vm12, %v596_v40, -inf }
 0x2df   : > { %v617_v45 = vsel %vm391_vm1, %v616_v43, -inf  ;;  %v607_v46 = vsel %vm391_vm1, %v606_v44, -inf  ;;  %v627_v49 = vsel %vm391_vm1, %v626_v47, -inf  ;;  %v637_v51 = vsel %vm391_vm1, %v636_v50, -inf }
 0x2e0   : > { %618 = vmax.xlane.f32.xlu1 %v617_v45  ;;  %608 = vmax.xlane.f32.xlu0 %v607_v46 }
 0x2e4   : > { %628 = vmax.xlane.f32.xlu0 %v627_v49 }
 0x2e8   : > { %638 = vmax.xlane.f32.xlu0 %v637_v51 }
 0x2f1   : > { %489 = vrot.lane.b32.xlu1 %v1814_v8, %s1511_s13 }
 0x2f5   : > { %493 = vrot.lane.b32.xlu1 %v1811_v7, %s1511_s13 }
 0x2f9   : > { %495 = vrot.lane.b32.xlu1 %v1817_v10, %s1511_s13 }
 0x2fe   : > { %491 = vrot.lane.b32.xlu0 %v1820_v11, %s1511_s13 }
 0x36d   : > { %v619_v58 = vpop.xlane.xlu1 %618  ;;  %v609_v59 = vpop.xlane.xlu0 %608 }
 0x36e   : > { %v610_v60 = vsel %vm602_vm8, %v609_v59, 0.0 }
 0x36f   : > { %v620_v63 = vsel %vm1849_vm7, %v619_v58, %v610_v60 }
 0x371   : > { %v490_v61 = vpop.permute.xlu1 %489  ;;  %v629_v62 = vpop.xlane.xlu0 %628 }
 0x372   : > { %v630_v2 = vsel %vm1853_vm9, %v629_v62, %v620_v63  ;;  %v501_v10 = vmul.f32 %v490_v61, %v1832_v19 }
 0x375   : > { %v494_v3 = vpop.permute.xlu1 %493  ;;  %v639_v4 = vpop.xlane.xlu0 %638 }
 0x376   : > { %v640_v5 = vsel %vm1864_vm12, %v639_v4, %v630_v2  ;;  %v503_v11 = vmul.f32 %v494_v3, %v1832_v19 }
 0x377   : > { %v641_v6 = vsub.f32 %v596_v40, %v640_v5 }
 0x379   : > { %v642_v7 = vmul.f32 1.442695, %v641_v6  ;;  %v496_v8 = vpop.permute.xlu1 %495  ;;  %v492_v9 = vpop.permute.xlu0 %491 }
 0x37a   : > { %v504_v12 = vmul.f32 %v496_v8, %v1832_v19  ;;  %v502_v13 = vmul.f32 %v492_v9, %v1832_v19  ;;  %v1160_v19 = vpack.c.bf16 %v815_v22, %v814_v20 }
 0x37b   : > { %1277 = vpow2.f32 %v642_v7 }
 0x37c   : > { %v1272_v14 = vpack.i.bf16 %v504_v12, %v503_v11  ;;  %v1267_v15 = vpack.i.bf16 %v502_v13, %v501_v10  ;;  %1161 = vmatpush3.bf16.msra.mxu1 %v1160_v19 }
 0x37e   : > { %1273 = vrot.lane.b32.xlu1 %v1272_v14, %s1511_s13  ;;  %1268 = vrot.lane.b32.xlu0 %v1267_v15, %s1511_s13 }
 0x385   : > { %v1278_v16 = vpop.eup %1277 }
 0x386   : > { %1106 = vmatmul.mubr.msk.f32.vlgmr.msra.gmra.mrb[2].mxu0 %vm391_vm1, %v1278_v16 }
 0x387   : > { %1116 = vmatprep.mubr.msk.f32.mxu0 %vm1507_vm0, %v1508_v1 }
 0x3f0   : > { %v1274_v23 = vpop.permute.xlu1 %1273  ;;  %v1269_v24 = vpop.permute.xlu0 %1268 }
 0x3f1   : > { %v1271_v25 = vunpack.i.h.bf16 %v1269_v24  ;;  %v1270_v26 = vunpack.i.l.bf16 %v1269_v24  ;;  %v1276_v27 = vunpack.i.h.bf16 %v1274_v23  ;;  %v1275_v28 = vunpack.i.l.bf16 %v1274_v23 }
 0x3f3   : > { %v1151_v29 = vpack.c.bf16 %v1271_v25, %v1270_v26  ;;  %v1154_v1 = vpack.c.bf16 %v1276_v27, %v1275_v28 }
 0x3f5   : > { %1152 = vmatpush3.bf16.msra.mxu0 %v1151_v29 }
 0x3f6   : > { %1153 = vmatprep.subr.bf16.mxu0 %v1506_v0 }
 0x3f9   : > { %1155 = vmatpush3.bf16.msra.mxu0 %v1154_v1 }
 0x459   : > { %v717_v30 = vpop.f32.mrb[2].mxu0 }
 0x45a   : > { %1279 = vrcp.f32 %v717_v30  ;;  %v1107_v31 = vpop.f32.mrb[3].mxu0 }
 0x464   : > { %v1280_v32 = vpop.eup %1279 }
 0x465   : > { %v722_v33 = vmul.f32 %v1280_v32, %v1278_v16 }
 0x467   : > { %1117 = vmatmul.mubr.msk.f32.vlgmr.msra.gmra.mrb[4].mxu0 %vm391_vm1, %v722_v33 }
 0x53a   : > { %v808_v34 = vpop.f32.mrb[4].mxu0 }
 0x53b   : > { %v1118_v35 = vpop.f32.mrb[5].mxu0  ;;  %1128 = vmatmul.mubr.msk.f32.vlgmr.msra.gmra.mrb[2].mxu1 %vm391_vm1, %v808_v34 }
 0x60e   : > { %v892_v0 = vpop.f32.mrb[2].mxu1 }
 0x60f   : > { %v893_v37 = vadd.f32 %v1044_v36, %v892_v0  ;;  %v1129_v38 = vpop.f32.mrb[3].mxu1 }
 0x611   : > { %896 = vst.msk [vmem:[%s378_s22] sm:$0xff] %vm391_vm1, %v893_v37 }
 0x612   : > { %1436 = shalt.err (!%p1433_p0)
}
 0x613   : > { %s1437_s1 = scalar_lea.hbm %s1911_s10, 128  ;;  %s1441_s25 = scalar_lea.hbm %s1963_s8, 512 }
 0x614   : > { %p1438_p2 = scmp.ne.s32.totalorder %s1911_s10, %s1437_s1  ;;  %p1442_p10 = scmp.lt.u32.totalorder %s1911_s10, %s1963_s8 }
 0x615   : > { %p1443_p11 = scmp.lt.u32.totalorder %s1441_s25, %s1437_s1  ;;  %p1445_p5 = scmp.lt.u32.totalorder %s1437_s1, %s1911_s10 }
 0x616   : > { %p1439_p7 = pnand %p1438_p2, %p1989_p4 }
 0x617   : > { %p1444_p1 = por %p1443_p11, %p1442_p10 }
 0x618   : > { %p1440_p9 = pneg %p1439_p7 }
 0x619   : > { %p1446_p6 = por %p1445_p5, %p1444_p1 }
 0x61b   : > { %p1447_p8 = pnand %p1446_p6, %p1440_p9 }
 0x61d   : > { %1450 = shalt.err (!%p1447_p8)
}
 0x61e   : > { %1180 = dma.vmem_to_hbm [thread:$0]  (%p1989_p4), %s1913_s17, 128, %s1911_s10, %s898_s15  }
 0x61f PF: > { %p1212_p12 = scmp.ge.s32.totalorder %s1497_s30, 2  ;;  %s923_s12 = sand.u32 1, %s1485_s27  }
 0x620   : > { %p1990_p3 = scmp.ne.s32.totalorder %s1976_s24, 0  ;;  %s924_s9 = scalar_lea.sflag [#allocation4], %s923_s12 }
 0x622   : > { %p1200_p13 = pnand %p1212_p12, %p1990_p3 }
 0x624   : > { %1480 = dma.done.wait (!%p1200_p13), %s924_s9, 128  }
 0x625   : > { %1482 = vsyncadd (!%p1200_p13), %s924_s9, 4294967168  ;;  %p23_p0 = scmp.ge.s32.totalorder %s1709_s23, 6   ;;  %s1991_s27 = smov %s1489_s28 }
 0x626   : > { %s1992_s28 = smov %s1493_s29  ;;  %s1993_s29 = smov %s1720_s21 }
 0x627   : > { %s1994_s30 = smov %s1709_s23  ;;  %25 = sbr.rel (!%p23_p0) target bundleno = 9 (0x9), region = 113 }
 0x62e   :  { %929 = vsyncpa [#allocation3], 1 }
 0x62f   :  { %931 = vsyncpa [#allocation3 + $0x1], 1 }
 0x630   :  { %932 = vsyncpa [#allocation6], 1 }
 0x631   :  { %933 = vsyncpa [#allocation9], 1 }
 0x632   :  { %934 = vsyncpa [#allocation4], 1 }
 0x633   :  { %936 = vsyncpa [#allocation4 + $0x1], 1 }

</bundles_post_ra>
